<compile_context>
chip_gen: v7x
topology: tpu7x:2x2x1
jax: 0.10.0
libtpu: 0.0.40
codegen_flags: <defaults>
</compile_context>

<pallas_src>
import jax
import jax.numpy as jnp
from jax.experimental import pallas as pl
from jax.experimental.pallas import tpu as pltpu

TILE_R = 512  # row tile for the batched grid (bf16 512x126 tile ~126 KB)


def _round_up(n, m):
    return ((n + m - 1) // m) * m


# ---------------------------------------------------------------------------
# Fused kernel: (TILE_R, K)bf16 @ (K, 16)bf16 -> f32, + bias, stable sigmoid.
# ---------------------------------------------------------------------------
def fused_gemm_sigmoid_kernel(x_ref, w_ref, b_ref, o_ref):
    z = (
        jnp.dot(x_ref[...], w_ref[...], preferred_element_type=jnp.float32)
        + b_ref[...]
    )
    # Numerically-stable sigmoid: one exp (EUP) + one approx reciprocal (EUP),
    # select/mul on VPU.  No VPU divides.
    e = jnp.exp(-jnp.abs(z))
    inv = pl.reciprocal(1.0 + e, approx=True)
    o_ref[...] = jnp.where(z >= 0.0, inv, e * inv)


def fused_forward(x_flat, w_eff, b_eff):
    n, k = x_flat.shape
    out_f = w_eff.shape[1]

    # Row tile: multiple of 8 sublanes, capped at TILE_R; pad batch to a
    # multiple of the tile so every block is full (no partial-block issues).
    tr = min(TILE_R, _round_up(n, 8))
    n_pad = _round_up(n, tr)
    if n_pad != n:
        x_flat = jnp.pad(x_flat, ((0, n_pad - n), (0, 0)))

    out = pl.pallas_call(
        fused_gemm_sigmoid_kernel,
        out_shape=jax.ShapeDtypeStruct((n_pad, out_f), jnp.float32),
        grid=(n_pad // tr,),
        in_specs=[
            pl.BlockSpec((tr, k), lambda i: (i, 0)),       # x: tiled over rows
            pl.BlockSpec((k, out_f), lambda i: (0, 0)),    # W_eff: VMEM-resident
            pl.BlockSpec((1, out_f), lambda i: (0, 0)),    # b_eff: VMEM-resident
        ],
        out_specs=pl.BlockSpec((tr, out_f), lambda i: (i, 0)),
        compiler_params=pltpu.CompilerParams(
            dimension_semantics=("parallel",),            # megacore on v7x
            vmem_limit_bytes=32 * 1024 * 1024,            # safe on v5e/v6e/v7x
        ),
    )(x_flat, w_eff, b_eff)

    return out[:n] if n_pad != n else out


# ---------------------------------------------------------------------------
# Parameter init (PyTorch-layout params) and one-time algebraic pre-composition
# into a single effective GEMM.  Done ONCE outside the jitted forward.
# ---------------------------------------------------------------------------
def init_params(key):
    k1, k2, k3, k4 = jax.random.split(key, 4)
    # Conv2d(3, 8, kernel_size=1): weight (8,3,1,1), bias (8,)
    bound1 = 1.0 / jnp.sqrt(3.0)
    w1 = jax.random.uniform(k1, (8, 3, 1, 1), jnp.float32, -bound1, bound1)
    b1 = jax.random.uniform(k2, (8,), jnp.float32, -bound1, bound1)
    # Linear(576, 16): weight (16, 576), bias (16,)
    bound2 = 1.0 / jnp.sqrt(576.0)
    wfc = jax.random.uniform(k3, (16, 576), jnp.float32, -bound2, bound2)
    bfc = jax.random.uniform(k4, (16,), jnp.float32, -bound2, bound2)
    return w1, b1, wfc, bfc


def precompose_params(w1, b1, wfc, bfc, H, W):
    """Fold conv1(1x1, pad=1) + NCHW flatten + fc into one (Cin*H*W, 16) GEMM."""
    cout1, cin = w1.shape[0], w1.shape[1]
    out_f = wfc.shape[0]
    Hp, Wp = H + 2, W + 2
    P = Hp * Wp
    if wfc.shape[1] != cout1 * P:
        raise ValueError(
            f"fc expects {wfc.shape[1]} features but conv1 output flattens to "
            f"{cout1 * P} for spatial size ({H},{W}); forward pass is inconsistent."
        )
    w1_mat = w1.reshape(cout1, cin)                      # (8, 3): w1_mat[k_out, c_in]
    wfc_r = wfc.reshape(out_f, cout1, Hp, Wp)            # (16, 8, Hp, Wp)
    wfc_int = wfc_r[:, :, 1 : 1 + H, 1 : 1 + W]          # interior (unpadded) pixels
    # W_eff[(c, h, w), o] = sum_k w1[k, c] * wfc[o, k, h+1, w+1]
    w_eff = jnp.einsum("kc,okhw->chwo", w1_mat, wfc_int).reshape(cin * H * W, out_f)
    # Padded-border + conv-bias contribution folds into the effective bias.
    b_eff = bfc + jnp.einsum("k,okp->o", b1, wfc.reshape(out_f, cout1, P))
    # bf16 weights for the MXU fast path (one-time cast); bias stays f32.
    return w_eff.astype(jnp.bfloat16), b_eff.reshape(1, out_f).astype(jnp.float32)


@jax.jit
def model_forward(x, w_eff, b_eff):
    n = x.shape[0]
    # Contiguous NCHW reshape == channel-major flatten; matches W_eff row layout.
    x_flat = x.reshape(n, -1).astype(jnp.bfloat16)
    return fused_forward(x_flat, w_eff, b_eff)


# Pure-JAX f32 reference of the original op-by-op pipeline (sanity check).
def reference_forward(x, w1, b1, wfc, bfc):
    n, cin, H, W = x.shape
    xp = jnp.pad(x, ((0, 0), (0, 0), (1, 1), (1, 1)))
    Hp, Wp = H + 2, W + 2
    xm = jnp.transpose(xp, (0, 2, 3, 1)).reshape(n * Hp * Wp, cin)
    v1 = xm @ w1.reshape(8, cin).T + b1
    v2 = jnp.transpose(v1.reshape(n, Hp, Wp, 8), (0, 3, 1, 2)).reshape(n, -1)
    v3 = v2 @ wfc.T + bfc
    return jax.nn.sigmoid(v3)


if __name__ == "__main__":
    key = jax.random.PRNGKey(0)
    kx, kp = jax.random.split(key)
    # Spatial size chosen so the forward pass is consistent: 8*(6+2)*(7+2) = 576.
    N, H, W = 4, 6, 7
    x = jax.random.normal(kx, (N, 3, H, W), dtype=jnp.float32)
    w1, b1, wfc, bfc = init_params(kp)

    # One-time weight composition (outside the per-call jitted path).
    w_eff, b_eff = precompose_params(w1, b1, wfc, bfc, H, W)

    out = model_forward(x, w_eff, b_eff)
    jax.block_until_ready(out)
    assert out.shape == (N, 16), out.shape

    ref = reference_forward(x, w1, b1, wfc, bfc)
    # bf16 matmul inputs + approx reciprocal -> ~1e-2 tolerance on [0,1] outputs.
    assert jnp.allclose(out, ref, atol=2e-2, rtol=2e-2), "mismatch vs reference"

    print("KERNEL_OK")
</pallas_src>

<mosaic_0001>
module attributes {stable_mosaic.version = 11 : i64} {
  func.func @fused_gemm_sigmoid_kernel(%arg0: i32, %arg1: memref<8x126xbf16, #tpu.memory_space<vmem>>, %arg2: memref<126x16xbf16, #tpu.memory_space<vmem>>, %arg3: memref<1x16xf32, #tpu.memory_space<vmem>>, %arg4: memref<8x16xf32, #tpu.memory_space<vmem>>) attributes {dimension_semantics = [#tpu.dimension_semantics<parallel>], iteration_bounds = array<i64: 1>, scalar_prefetch = 0 : i64, scratch_operands = 0 : i64, tpu.core_type = #tpu.core_type<tc>, window_params = [{transform_indices = @transform_0, window_bounds = array<i64: 8, 126>}, {pipeline_mode = #tpu.pipeline_mode<synchronous>, transform_indices = @transform_1, window_bounds = array<i64: 126, 16>}, {pipeline_mode = #tpu.pipeline_mode<synchronous>, transform_indices = @transform_2, window_bounds = array<i64: 1, 16>}, {transform_indices = @transform_3, window_bounds = array<i64: 8, 16>}]} {
    %c0 = arith.constant 0 : index
    %c0_0 = arith.constant 0 : index
    %0 = vector.load %arg1[%c0, %c0_0] : memref<8x126xbf16, #tpu.memory_space<vmem>>, vector<8x126xbf16>
    %c0_1 = arith.constant 0 : index
    %c0_2 = arith.constant 0 : index
    %1 = vector.load %arg2[%c0_1, %c0_2] : memref<126x16xbf16, #tpu.memory_space<vmem>>, vector<126x16xbf16>
    %cst = arith.constant dense<0.000000e+00> : vector<8x16xf32>
    %2 = tpu.matmul %0, %1, %cst {dimension_numbers = #tpu.dot_dimension_numbers<[1], [0], [0], [1], [0, 0, 1, 1], [], []>} : vector<8x126xbf16>, vector<126x16xbf16>, vector<8x16xf32> -> vector<8x16xf32>
    %c0_3 = arith.constant 0 : index
    %c0_4 = arith.constant 0 : index
    %3 = vector.load %arg3[%c0_3, %c0_4] : memref<1x16xf32, #tpu.memory_space<vmem>>, vector<1x16xf32>
    %4 = vector.broadcast %3 : vector<1x16xf32> to vector<8x16xf32>
    %5 = arith.addf %2, %4 : vector<8x16xf32>
    %6 = math.absf %5 : vector<8x16xf32>
    %cst_5 = arith.constant 0.000000e+00 : f32
    %7 = vector.broadcast %cst_5 : f32 to vector<8x16xf32>
    %8 = arith.subf %7, %6 : vector<8x16xf32>
    %9 = math.exp %8 : vector<8x16xf32>
    %cst_6 = arith.constant 1.000000e+00 : f32
    %10 = vector.broadcast %cst_6 : f32 to vector<8x16xf32>
    %11 = arith.addf %10, %9 : vector<8x16xf32>
    %12 = tpu.reciprocal %11 {approx = true} : vector<8x16xf32> -> vector<8x16xf32>
    %cst_7 = arith.constant 0.000000e+00 : f32
    %13 = vector.broadcast %cst_7 : f32 to vector<8x16xf32>
    %14 = arith.cmpf oge, %5, %13 : vector<8x16xf32>
    %15 = arith.mulf %9, %12 : vector<8x16xf32>
    %16 = arith.select %14, %12, %15 : vector<8x16xi1>, vector<8x16xf32>
    %c0_8 = arith.constant 0 : index
    %c0_9 = arith.constant 0 : index
    %17 = vector.load %arg4[%c0_8, %c0_9] : memref<8x16xf32, #tpu.memory_space<vmem>>, vector<8x16xf32>
    tpu.vector_store %arg4[%c0_8, %c0_9], %16 {strides = array<i32>} : memref<8x16xf32, #tpu.memory_space<vmem>>, vector<8x16xf32>,
    return
  }
  func.func @transform_0(%arg0: i32) -> (i32, i32) {
    %c0_i32 = arith.constant 0 : i32
    %c0_i32_0 = arith.constant 0 : i32
    return %arg0, %c0_i32 : i32, i32
  }
  func.func @transform_1(%arg0: i32) -> (i32, i32) {
    %c0_i32 = arith.constant 0 : i32
    %c0_i32_0 = arith.constant 0 : i32
    %c0_i32_1 = arith.constant 0 : i32
    return %c0_i32, %c0_i32_0 : i32, i32
  }
  func.func @transform_2(%arg0: i32) -> (i32, i32) {
    %c0_i32 = arith.constant 0 : i32
    %c0_i32_0 = arith.constant 0 : i32
    %c0_i32_1 = arith.constant 0 : i32
    return %c0_i32, %c0_i32_0 : i32, i32
  }
  func.func @transform_3(%arg0: i32) -> (i32, i32) {
    %c0_i32 = arith.constant 0 : i32
    %c0_i32_0 = arith.constant 0 : i32
    return %arg0, %c0_i32 : i32, i32
  }
}

</mosaic_0001>

<bundles_post_ra>
// kernel: model_forward.1
= control target key start
LH: loop header
LB: loop body
LE: loop exit
PB: predicated region body
PF: predicated region fallthrough
CT: control target
= control target key end

     0   :  { %v202_v0 = vmov 0.0   ;;  %vm203_vm0 = vmmov 0   ;;  %vm90_vm1 = vcmask 1046528   ;;  %vm86_vm2 = vcmask 1031168   ;;  %s257_s1 = inlined_call_operand.vmem [shape: bf16[126,16], index: 1, kind: input, shape index: {}]   ;;  %s258_s0 = inlined_call_operand.vmem [shape: bf16[8,126], index: 0, kind: input, shape index: {}]   ;;  %s259_s2 = inlined_call_operand.vmem [shape: f32[1,16], index: 2, kind: input, shape index: {}]   ;;  %s260_s3 = inlined_call_operand.vmem [shape: f32[8,16], index: 3, kind: output, shape index: {}]  }
   0x1   :  { %168 = vmatprep.subr.bf16.mxu0 %v202_v0  ;;  %v190_v1 = vld [vmem:[%s257_s1] sm:$0xff]   ;;  %184 = vmatprep.mubr.msk.bf16.mxu0 %vm203_vm0, %v202_v0  ;;  %v191_v2 = vld [vmem:[%s257_s1 + $0x8] sm:$0xff]   ;;  %v192_v3 = vld [vmem:[%s257_s1 + $0x10] sm:$0xff]   ;;  %vm143_vm3 = vcmask 130048  }
   0x2   :  { %169 = vmatpush3.bf16.msra.mxu0 %v190_v1  ;;  %v193_v4 = vld [vmem:[%s257_s1 + $0x18] sm:$0xff]   ;;  %v194_v5 = vld [vmem:[%s257_s1 + $0x20] sm:$0xff]   ;;  %v195_v6 = vld [vmem:[%s257_s1 + $0x28] sm:$0xff]  }
   0x3   :  { %170 = vmatprep.subr.bf16.mxu0 %v202_v0  ;;  %v196_v7 = vld [vmem:[%s257_s1 + $0x30] sm:$0xff]   ;;  %v197_v8 = vld [vmem:[%s257_s1 + $0x38] sm:$0x7f]   ;;  %v15_v10 = vld [vmem:[%s258_s0] sm:$0xf] }
   0x4   :  { %v92_v9 = vsel %vm90_vm1, %v197_v8, 0  ;;  %v149_v11 = vld [vmem:[%s259_s2] ss:$0 sm:$0xff] }
   0x6   :  { %171 = vmatpush3.bf16.msra.mxu0 %v191_v2 }
   0x7   :  { %172 = vmatprep.subr.bf16.mxu0 %v202_v0 }
   0xa   :  { %173 = vmatpush3.bf16.msra.mxu0 %v192_v3 }
   0xb   :  { %174 = vmatprep.subr.bf16.mxu0 %v202_v0 }
   0xe   :  { %175 = vmatpush3.bf16.msra.mxu0 %v193_v4 }
   0xf   :  { %176 = vmatprep.subr.bf16.mxu0 %v202_v0 }
  0x12   :  { %177 = vmatpush3.bf16.msra.mxu0 %v194_v5 }
  0x13   :  { %178 = vmatprep.subr.bf16.mxu0 %v202_v0 }
  0x16   :  { %179 = vmatpush3.bf16.msra.mxu0 %v195_v6 }
  0x17   :  { %180 = vmatprep.subr.bf16.mxu0 %v202_v0 }
  0x1a   :  { %181 = vmatpush3.bf16.msra.mxu0 %v196_v7 }
  0x1b   :  { %182 = vmatprep.subr.bf16.mxu0 %v202_v0 }
  0x1e   :  { %183 = vmatpush3.bf16.msra.mxu0 %v92_v9 }
  0x21   :  { %185 = vmatmul.mubr.msk.bf16.vlgmr.msra.gmra.mrb[0].mxu0 %vm86_vm2, %v15_v10 }
  0xf4   :  { %v128_v12 = vpop.f32.mrb[0].mxu0 }
  0xf5   :  { %v129_v13 = vadd.f32 %v149_v11, %v128_v12  ;;  %v186_v14 = vpop.f32.mrb[1].mxu0 }
  0xf6   :  { %v131_v15 = vpop.f32.mrb[2].mxu0 }
  0xf7   :  { %v134_v16 = vand.u32 2147483647, %v129_v13  ;;  %v187_v17 = vpop.f32.mrb[3].mxu0  ;;  %vm140_vm4 = vcmp.ge.f32.partialorder %v129_v13, 0.0 }
  0xf9   :  { %v135_v18 = vsub.f32 0.0, %v134_v16 }
  0xfb   :  { %v136_v19 = vmul.f32 1.442695, %v135_v18 }
  0xfd   :  { %198 = vpow2.f32 %v136_v19 }
 0x107   :  { %v199_v20 = vpop.eup %198 }
 0x108   :  { %v138_v21 = vadd.f32 1.0, %v199_v20 }
 0x10a   :  { %200 = vrcp.f32 %v138_v21 }
 0x114   :  { %v201_v22 = vpop.eup %200 }
 0x115   :  { %v141_v23 = vmul.f32 %v201_v22, %v199_v20 }
 0x117   :  { %v142_v24 = vsel %vm140_vm4, %v201_v22, %v141_v23 }
 0x118   :  { %144 = vst.msk [vmem:[%s260_s3] sm:$0xff] %vm143_vm3, %v142_v24 }

</bundles_post_ra>
